<compile_context>
chip_gen: v5e
topology: v5e:2x2
jax: 0.10.0
libtpu: 0.0.40
codegen_flags: <defaults>
</compile_context>

<pallas_src>
import functools

import jax
import jax.numpy as jnp
from jax import lax
from jax.experimental import pallas as pl
from jax.experimental.pallas import tpu as pltpu


# ----------------------------- Pallas kernels ------------------------------ #

def _gemv_kernel_single_k(x_ref, w_ref, o_ref):
    # x_ref: (tm, K) input rows (MXU push operand)
    # w_ref: (S,  K) weight rows (stationary operand)
    # o_ref: (tm, S) output tile
    o_ref[...] = lax.dot_general(
        x_ref[...], w_ref[...],
        dimension_numbers=(((1,), (1,)), ((), ())),
        preferred_element_type=jnp.float32,
    ).astype(o_ref.dtype)


def _gemv_kernel_ktiled(x_ref, w_ref, o_ref, acc_ref):
    # Same as above but with the feature axis tiled; acc_ref (tm, S) f32 is
    # resident across the (last, "arbitrary") K grid axis.
    part = lax.dot_general(
        x_ref[...], w_ref[...],
        dimension_numbers=(((1,), (1,)), ((), ())),
        preferred_element_type=jnp.float32,
    )
    k = pl.program_id(1)

    @pl.when(k == 0)
    def _first():
        acc_ref[...] = part            # no separate zero-fill pass

    @pl.when(k != 0)
    def _rest():
        acc_ref[...] += part

    @pl.when(k == pl.num_programs(1) - 1)
    def _store():
        o_ref[...] = acc_ref[...].astype(o_ref.dtype)


def _round_up(v, m):
    return ((v + m - 1) // m) * m


@functools.partial(jax.jit, static_argnames=("tm", "tk"))
def pallas_linear(x, w, *, tm=1024, tk=2048):
    """y = x @ w.T via Pallas.

    x: (N, dim_in) f32 or bf16, w: (S, dim_in) -> y: (N, S) f32.
    S == 1 for the plain LinearLayer forward; S > 1 batches several weight
    samples against a single HBM read of x.

    The GEMV is HBM-bandwidth bound, so x is never copied in the wrapper:
    ragged N is handled by a cdiv grid (partial last block), and only the rare
    dim_in > tk non-divisible case pays a K zero-padding pass.
    """
    assert tm % 128 == 0 and tk % 128 == 0
    N, dim_in = x.shape
    S = w.shape[0]
    assert w.shape == (S, dim_in)

    # Tiny cast so mixed f32/bf16 operands are legal; x itself is untouched.
    if w.dtype != x.dtype:
        w = w.astype(x.dtype)

    # Row tile: shrink (down to 256) so the "parallel" M axis keeps >= 2 blocks
    # (v7x megacore).  If the whole batch fits one tile, take it exactly.
    tm_eff = tm
    while tm_eff > 256 and pl.cdiv(N, tm_eff) < 2:
        tm_eff //= 2
    if N < tm_eff:
        tm_eff = N                      # full-dim block, no (8,128) issue
    num_m = pl.cdiv(N, tm_eff)

    # Feature axis: keep whole when it fits one block, otherwise tile (+ pad
    # only if dim_in is not a multiple of tk — rare).
    if dim_in <= tk:
        tk_eff, num_k, kp = dim_in, 1, dim_in
    else:
        tk_eff = tk
        kp = _round_up(dim_in, tk)
        num_k = kp // tk
        if kp != dim_in:
            # OOB K columns must contribute zero to the reduction; padding is
            # the only extra pass over x and only on this rare path.
            x = jnp.pad(x, ((0, 0), (0, kp - dim_in)))
            w = jnp.pad(w, ((0, 0), (0, kp - dim_in)))

    itemsize = jnp.dtype(x.dtype).itemsize
    cost = pl.CostEstimate(
        flops=2 * N * kp * S,
        transcendentals=0,
        bytes_accessed=itemsize * (N * kp + num_m * S * kp) + 4 * N * S,
    )
    vmem_limit = 40 * 1024 * 1024       # safe on v5e/v6e (128 MiB) & v7x (64 MiB)

    if num_k == 1:
        out = pl.pallas_call(
            _gemv_kernel_single_k,
            out_shape=jax.ShapeDtypeStruct((N, S), jnp.float32),
            grid_spec=pltpu.PrefetchScalarGridSpec(
                num_scalar_prefetch=0,
                grid=(num_m,),
                in_specs=[
                    pl.BlockSpec((tm_eff, tk_eff), lambda i: (i, 0)),
                    pl.BlockSpec((S, tk_eff), lambda i: (0, 0)),
                ],
                out_specs=pl.BlockSpec((tm_eff, S), lambda i: (i, 0)),
            ),
            compiler_params=pltpu.CompilerParams(
                dimension_semantics=("parallel",),
                vmem_limit_bytes=vmem_limit,
            ),
            cost_estimate=cost,
        )(x, w)
    else:
        out = pl.pallas_call(
            _gemv_kernel_ktiled,
            out_shape=jax.ShapeDtypeStruct((N, S), jnp.float32),
            grid_spec=pltpu.PrefetchScalarGridSpec(
                num_scalar_prefetch=0,
                grid=(num_m, num_k),                 # reduction (K) axis last
                in_specs=[
                    pl.BlockSpec((tm_eff, tk_eff), lambda i, k: (i, k)),
                    pl.BlockSpec((S, tk_eff), lambda i, k: (0, k)),
                ],
                out_specs=pl.BlockSpec((tm_eff, S), lambda i, k: (i, 0)),
                scratch_shapes=[pltpu.VMEM((tm_eff, S), jnp.float32)],
            ),
            compiler_params=pltpu.CompilerParams(
                dimension_semantics=("parallel", "arbitrary"),
                vmem_limit_bytes=vmem_limit,
            ),
            cost_estimate=cost,
        )(x, w)
    return out


# Below ~2 MiB of x the pallas_call fixed cost dominates; XLA's fused GEMV is
# already at the HBM roofline there.
# TODO(synk): profile the exact crossover (review suggests 1-4 MiB).
_PALLAS_MIN_BYTES = 2 * 1024 * 1024


def linear_forward(x, w):
    """y = x @ w.T (f32 accumulation) with a small-problem fallback to XLA."""
    N, dim_in = x.shape
    if N * dim_in * jnp.dtype(x.dtype).itemsize < _PALLAS_MIN_BYTES:
        return lax.dot_general(
            x, w.astype(x.dtype),
            dimension_numbers=(((1,), (1,)), ((), ())),
            preferred_element_type=jnp.float32,
        )
    return pallas_linear(x, w)


# --------------------------- LinearLayer (JAX) ----------------------------- #

class LinearLayer:
    """JAX/Pallas port of the Bayesian LinearLayer (1-d output)."""

    def __init__(self, dim_in, prior_mu=0.0, prior_sig2=1.0, sig2_y=0.1, *,
                 key=None):
        self.dim_in = dim_in
        self.prior_mu = prior_mu
        self.prior_sig2 = prior_sig2
        self.sig2_y = sig2_y
        if key is None:
            key = jax.random.PRNGKey(0)
        self._key = key
        self.init_parameters()
        self.w = self.sample_weights(store=True)

    def _next_key(self):
        self._key, sub = jax.random.split(self._key)
        return sub

    def init_parameters(self):
        # mu ~ Normal(0, 1), sig2 = prior_sig2 * I
        self.mu = jax.random.normal(self._next_key(), (1, self.dim_in),
                                    dtype=jnp.float32)
        self.sig2 = self.prior_sig2 * jnp.eye(self.dim_in, dtype=jnp.float32)

    def sample_weights(self, store=False, prior=False):
        if prior:
            mu = self.prior_mu * jnp.ones((1, self.dim_in), dtype=jnp.float32)
            sig2 = self.prior_sig2 * jnp.eye(self.dim_in, dtype=jnp.float32)
        else:
            mu = self.mu
            sig2 = self.sig2
        # w ~ MVN(mu, sig2) via Cholesky: w = mu + z @ L.T   (plain JAX glue)
        L = jnp.linalg.cholesky(sig2)
        z = jax.random.normal(self._next_key(), (1, self.dim_in),
                              dtype=jnp.float32)
        w = mu + z @ L.T
        if store:
            self.w = w
        return w

    def fixed_point_updates(self, x, y):
        prior_sig2inv_mat = (1.0 / self.prior_sig2) * jnp.eye(
            self.dim_in, dtype=jnp.float32)
        prior_mu_vec = jnp.ones((self.dim_in, 1), dtype=jnp.float32) * self.prior_mu
        self.sig2 = jnp.linalg.inv(prior_sig2inv_mat + x.T @ x / self.sig2_y)
        self.mu = (self.sig2 @ (prior_sig2inv_mat @ prior_mu_vec
                                + x.T @ y / self.sig2_y)).T

    def forward(self, x, weights_type="sample_post"):
        if weights_type == "mean_prior":
            # TODO(synk): F.linear(x, float) errors in PyTorch too; use a
            # constant weight row so this branch is well-defined here.
            w = self.prior_mu * jnp.ones((1, self.dim_in), dtype=jnp.float32)
        elif weights_type == "mean_post":
            w = self.mu
        elif weights_type == "sample_prior":
            w = self.sample_weights(store=False, prior=True)
        elif weights_type == "sample_post":
            w = self.sample_weights(store=False, prior=False)
        elif weights_type == "stored":
            w = self.w
        else:
            raise ValueError(f"unknown weights_type {weights_type}")
        return linear_forward(x, w)

    __call__ = forward


# --------------------------------- main ------------------------------------ #

if __name__ == "__main__":
    key = jax.random.PRNGKey(0)
    k_x, k_layer, k_small = jax.random.split(key, 3)

    # Small but Pallas-exercising: 1024 x 256 f32 = 1 MiB.
    N, dim_in = 1024, 256
    x = jax.random.normal(k_x, (N, dim_in), dtype=jnp.float32)

    layer = LinearLayer(dim_in, prior_mu=0.0, prior_sig2=1.0, sig2_y=0.1,
                        key=k_layer)
    w = layer.w                                    # (1, dim_in) f32
    y_ref = x @ w.T

    # 1) Pallas kernel, f32, N divisible by the row tile.
    y = jax.block_until_ready(pallas_linear(x, w))
    assert y.shape == (N, 1)
    assert jnp.allclose(y, y_ref, atol=1e-3, rtol=1e-4)

    # 2) Ragged N: partial last row block handled in-kernel (no wrapper pad).
    N2 = 1000
    y_rag = jax.block_until_ready(pallas_linear(x[:N2], w))
    assert y_rag.shape == (N2, 1)
    assert jnp.allclose(y_rag, y_ref[:N2], atol=1e-3, rtol=1e-4)

    # 3) bfloat16 inputs, f32 accumulation (looser tolerance).
    y_bf = jax.block_until_ready(pallas_linear(x.astype(jnp.bfloat16), w))
    assert y_bf.shape == (N, 1)
    assert jnp.allclose(y_bf, y_ref, atol=0.25, rtol=0.05)

    # 4) K-tiled (multi-K) kernel + rare K-padding path, exercised with tk=128.
    x_k = jax.random.normal(k_small, (512, 400), dtype=jnp.float32)
    w_k = jax.random.normal(jax.random.PRNGKey(7), (1, 400), dtype=jnp.float32)
    y_k = jax.block_until_ready(pallas_linear(x_k, w_k, tk=128))
    assert y_k.shape == (512, 1)
    assert jnp.allclose(y_k, x_k @ w_k.T, atol=1e-3, rtol=1e-4)

    # 5) Batched weight samples: one HBM read of x for 4 GEMVs.
    W4 = jax.random.normal(jax.random.PRNGKey(3), (4, dim_in), dtype=jnp.float32)
    y4 = jax.block_until_ready(pallas_linear(x, W4))
    assert y4.shape == (N, 4)
    assert jnp.allclose(y4, x @ W4.T, atol=1e-3, rtol=1e-4)

    # 6) Layer forward paths (this size routes through the XLA fallback) and
    #    the small-problem / sampling paths.
    y_layer = jax.block_until_ready(layer(x, weights_type="stored"))
    assert jnp.allclose(y_layer, y_ref, atol=1e-3, rtol=1e-4)

    small_layer = LinearLayer(32, key=k_layer)
    xs = jax.random.normal(k_small, (16, 32), dtype=jnp.float32)
    ys = jax.block_until_ready(small_layer(xs, weights_type="stored"))
    assert ys.shape == (16, 1)
    assert jnp.allclose(ys, xs @ small_layer.w.T, atol=1e-4, rtol=1e-4)

    y_samp = jax.block_until_ready(layer(x, weights_type="sample_post"))
    assert y_samp.shape == (N, 1)

    print("KERNEL_OK")
</pallas_src>

<mosaic_0001>
module attributes {stable_mosaic.version = 11 : i64} {
  func.func @_gemv_kernel_single_k(%arg0: i32, %arg1: memref<512x256xf32, #tpu.memory_space<vmem>>, %arg2: memref<1x256xf32, #tpu.memory_space<vmem>>, %arg3: memref<512x1xf32, #tpu.memory_space<vmem>>) attributes {dimension_semantics = [#tpu.dimension_semantics<parallel>], iteration_bounds = array<i64: 2>, scalar_prefetch = 0 : i64, scratch_operands = 0 : i64, tpu.core_type = #tpu.core_type<tc>, window_params = [{transform_indices = @transform_0, window_bounds = array<i64: 512, 256>}, {pipeline_mode = #tpu.pipeline_mode<synchronous>, transform_indices = @transform_1, window_bounds = array<i64: 1, 256>}, {transform_indices = @transform_2, window_bounds = array<i64: 512, 1>}]} {
    %c0 = arith.constant 0 : index
    %c0_0 = arith.constant 0 : index
    %0 = vector.load %arg1[%c0, %c0_0] : memref<512x256xf32, #tpu.memory_space<vmem>>, vector<512x256xf32>
    %c0_1 = arith.constant 0 : index
    %c0_2 = arith.constant 0 : index
    %1 = vector.load %arg2[%c0_1, %c0_2] : memref<1x256xf32, #tpu.memory_space<vmem>>, vector<1x256xf32>
    %cst = arith.constant dense<0.000000e+00> : vector<512x1xf32>
    %2 = tpu.matmul %0, %1, %cst {dimension_numbers = #tpu.dot_dimension_numbers<[1], [1], [0], [0], [0, 0, 1, 0], [], []>} : vector<512x256xf32>, vector<1x256xf32>, vector<512x1xf32> -> vector<512x1xf32>
    %c0_3 = arith.constant 0 : index
    %c0_4 = arith.constant 0 : index
    %3 = vector.load %arg3[%c0_3, %c0_4] : memref<512x1xf32, #tpu.memory_space<vmem>>, vector<512x1xf32>
    tpu.vector_store %arg3[%c0_3, %c0_4], %2 {strides = array<i32>} : memref<512x1xf32, #tpu.memory_space<vmem>>, vector<512x1xf32>,
    return
  }
  func.func @transform_0(%arg0: i32) -> (i32, i32) {
    %c0_i32 = arith.constant 0 : i32
    %c0_i32_0 = arith.constant 0 : i32
    return %arg0, %c0_i32 : i32, i32
  }
  func.func @transform_1(%arg0: i32) -> (i32, i32) {
    %c0_i32 = arith.constant 0 : i32
    %c0_i32_0 = arith.constant 0 : i32
    %c0_i32_1 = arith.constant 0 : i32
    return %c0_i32, %c0_i32_0 : i32, i32
  }
  func.func @transform_2(%arg0: i32) -> (i32, i32) {
    %c0_i32 = arith.constant 0 : i32
    %c0_i32_0 = arith.constant 0 : i32
    return %arg0, %c0_i32 : i32, i32
  }
}

</mosaic_0001>

<bundles_post_ra>
// kernel: pallas_linear.1
= control target key start
LH: loop header
LB: loop body
LE: loop exit
PB: predicated region body
PF: predicated region fallthrough
CT: control target
= control target key end

     0   :  { %7 = vsyncpa [#allocation3], 0  ;;  %s1472_s0 = inlined_call_operand.hbm [shape: f32[1024,256], index: 0, kind: input, shape index: {}]   ;;  %s1473_s1 = inlined_call_operand.hbm [shape: f32[1,256], index: 1, kind: input, shape index: {}]   ;;  %s1474_s2 = inlined_call_operand.vmem [shape: f32[1024,1], index: 2, kind: output, shape index: {}]  }
   0x1   :  { %9 = vsyncpa [#allocation3 + $0x1], 0 }
   0x2   :  { %10 = vsyncpa [#allocation5], 0  ;;  %s968_s9 = smov 0   ;;  %s970_s10 = smov 0  }
   0x3   :  { %s972_s11 = smov 0   ;;  %s974_s12 = smov 0  }
   0x4 LB: > { %s780_s13 = sadd.s32 4294967295, %s948_s12   ;;  %s988_s14 = sadd.s32 1, %s948_s12   ;;  %s948_s12 = sphi %s974_s12, %s1483_s12   ;;  %s944_s11 = sphi %s972_s11, %s1482_s11   ;;  %s940_s10 = sphi %s970_s10, %s1481_s10   ;;  %s936_s9 = sphi %s968_s9, %s1480_s9  }
   0x5   : > { %s20_s15 = ssub.s32 %s948_s12, %s988_s14  ;;  %s23_s16 = sadd.s32 1, %s944_s11 }
   0x6   : > { %p21_p0 = scmp.eq.s32.totalorder %s20_s15, 0  ;;  %p30_p1 = scmp.ne.s32.totalorder %s944_s11, %s940_s10 }
   0x7   : > { %p31_p2 = scmp.eq.s32.totalorder %s948_s12, 0  ;;  %p36_p3 = scmp.ne.s32.totalorder %s940_s10, %s936_s9 }
   0x8   : > { %s998_s17 = scalar_select %p21_p0, %s944_s11, %s23_s16  }
   0x9   : > { %p1000_p4 = por %p31_p2, %p30_p1  ;;  %p1006_p5 = scmp.eq.s32.totalorder %s780_s13, 0 }
   0xa   : > { %p782_p6 = scmp.ge.s32.totalorder %s948_s12, 1  ;;  %p94_p7 = scmp.lt.s32.totalorder %s948_s12, 3 }
   0xb   : > { %p1014_p8 = por %p1006_p5, %p36_p3  ;;  %s106_s24 = sshll.u32 %s1473_s1, 4  ;;  %s107_s24 = int_to_ptr.hbm [resolvable:$true] %s106_s24 }
   0xc   : > { %p1018_p9 = pnand %p782_p6, %p94_p7  ;;  %s950_s25 = smov [#allocation4]  }
   0xd   : > { %s108_s26 = sshll.u32 %s950_s25, 4  ;;  %p813_p12 = scmp.lt.s32.totalorder %s948_s12, 2  ;;  %s109_s26 = int_to_ptr.vmem [resolvable:$true] %s108_s26 }
   0xe   : > { %p804_p10 = pneg %p1018_p9  ;;  %s119_s27 = sand.u32 1, %s944_s11  }
   0xf   : > { %s797_s28 = sshll.u32 %s948_s12, 10  ;;  %p1034_p13 = pnand %p813_p12, %p1000_p4 }
  0x10   : > { %p805_p11 = pnand %p804_p10, %p1006_p5  ;;  %s785_s30 = sshll.u32 %s119_s27, 10 }
  0x11   : > { %s129_s5 = scalar_lea.hbm %s1472_s0, %s797_s28  ;;  %s123_s7 = scalar_lea.vmem [#allocation2], %s785_s30 }
  0x12   : > { %807 = dma.hbm_to_vmem [thread:$0]  (!%p805_p11), %s107_s24, 32, %s109_s26, [#allocation5]  }
  0x13   : > { %s130_s6 = sshll.u32 %s129_s5, 4  ;;  %s132_s8 = sshll.u32 %s123_s7, 4  ;;  %s131_s6 = int_to_ptr.hbm [resolvable:$true] %s130_s6  ;;  %s133_s8 = int_to_ptr.vmem [resolvable:$true] %s132_s8 }
  0x14   : > { %s120_s9 = scalar_lea.sflag [#allocation3], %s119_s27  ;;  %s880_s15 = sshra.s32 %s131_s6, 4  ;;  %s881_s15 = int_to_ptr.hbm [resolvable:$true] %s880_s15 }
  0x15   : > { %s882_s16 = scalar_lea.hbm %s881_s15, 1024  ;;  %p884_p1 = pneg %p1034_p13 }
  0x16   : > { %p883_p0 = scmp.ne.s32.totalorder %s881_s15, %s882_s16  ;;  %s887_s23 = scalar_lea.hbm %s1472_s0, 2048 }
  0x17   : > { %p888_p4 = scmp.lt.s32.totalorder %s881_s15, %s1472_s0  ;;  %p889_p6 = scmp.lt.s32.totalorder %s887_s23, %s882_s16 }
  0x18   : > { %p885_p2 = pnand %p884_p1, %p883_p0 }
  0x19   : > { %p890_p7 = por %p889_p6, %p888_p4 }
  0x1a   : > { %p886_p3 = pneg %p885_p2 }
  0x1c   : > { %p891_p10 = pnand %p890_p7, %p886_p3 }
  0x1e   : > { %894 = shalt.err (!%p891_p10)
}
  0x1f   : > { %s951_s26 = smov 256   ;;  %s952_s27 = smov 16  }
  0x20   : > { %811 = dma.hbm_to_vmem [thread:$0]  (!%p1034_p13), %s131_s6, 16384, %s133_s8, %s120_s9, %s951_s26, %s951_s26, %s952_s27  }
  0x21   : > { %144 = sbr.rel (%p1018_p9) target bundleno = 334 (0x14e), region = 28  ;;  %s146_s28 = sand.u32 (!%p1018_p9), 1, %s940_s10  }
  0x22   : > { %s790_s30 = sshll.u32 (!%p1018_p9), %s146_s28, 10  ;;  %s147_s3 = scalar_lea.sflag (!%p1018_p9), [#allocation3], %s146_s28 }
  0x23   : > { %s1054_s4 = scalar_lea.vmem (!%p1018_p9), [#allocation2], %s790_s30 }
  0x26   : > { %927 = dma.done.wait (%p1014_p8), %s147_s3, 16384  }
  0x27   : > { %929 = vsyncadd (%p1014_p8), %s147_s3, 4294950912 }
  0x28   : > { %931 = dma.done.wait (%p1006_p5), [#allocation5], 32  }
  0x29   : > { %933 = vsyncadd (%p1006_p5), [#allocation5], 4294967264  ;;  %v184_v0 = vld [vmem:[%s1054_s4] sm:$0xff]  ;;  %v185_v1 = vld [vmem:[%s1054_s4 + $0x8] sm:$0xff]  ;;  %s792_s19 = sshll.u32 %s780_s13, 6  ;;  %vm638_vm0 = vcmask 7168  }
  0x2a   : > { %v312_v2 = vld [vmem:[#allocation4] sm:$0x3]  ;;  %v193_v6 = vld [vmem:[%s1054_s4 + $0x48] sm:$0xff]  ;;  %v186_v13 = vld [vmem:[%s1054_s4 + $0x10] sm:$0xff]  ;;  %p179_p5 = scmp.lt.s32.totalorder %s792_s19, 127 }
  0x2b   : > { %v1066_v3 = vperm.slane %v312_v2, 0  ;;  %v1068_v4 = vperm.slane %v312_v2, 1  ;;  %v192_v5 = vld [vmem:[%s1054_s4 + $0x40] sm:$0xff]  ;;  %v189_v8 = vld [vmem:[%s1054_s4 + $0x28] sm:$0xff]  ;;  %v187_v16 = vld [vmem:[%s1054_s4 + $0x18] sm:$0xff] }
  0x2c   : > { %v188_v7 = vld [vmem:[%s1054_s4 + $0x20] sm:$0xff]  ;;  %v194_v17 = vld [vmem:[%s1054_s4 + $0x50] sm:$0xff]  ;;  %v195_v18 = vld [vmem:[%s1054_s4 + $0x58] sm:$0xff]  ;;  %s1485_s19 = smov (!%p179_p5, %s792_s19), 127 }
  0x2d   : > { %v318_v9 = vmul.f32 %v1066_v3, %v184_v0  ;;  %v319_v10 = vmul.f32 %v1068_v4, %v185_v1  ;;  %v326_v11 = vmul.f32 %v1066_v3, %v192_v5  ;;  %v327_v12 = vmul.f32 %v1068_v4, %v193_v6  ;;  %v190_v21 = vld [vmem:[%s1054_s4 + $0x30] sm:$0xff]  ;;  %v191_v22 = vld [vmem:[%s1054_s4 + $0x38] sm:$0xff]  ;;  %v196_v32 = vld [vmem:[%s1054_s4 + $0x60] sm:$0xff]  ;;  %s793_s12 = sshll.u32 %s1485_s19, 3 }
  0x2e   : > { %v322_v14 = vmul.f32 %v1066_v3, %v188_v7  ;;  %v323_v15 = vmul.f32 %v1068_v4, %v189_v8  ;;  %v320_v24 = vmul.f32 %v1066_v3, %v186_v13  ;;  %v321_v25 = vmul.f32 %v1068_v4, %v187_v16  ;;  %v197_v34 = vld [vmem:[%s1054_s4 + $0x68] sm:$0xff]  ;;  %v200_v35 = vld [vmem:[%s1054_s4 + $0x80] sm:$0xff]  ;;  %v198_v37 = vld [vmem:[%s1054_s4 + $0x70] sm:$0xff]  ;;  %s1263_s21 = scalar_lea.vmem %s1474_s2, %s793_s12 }
  0x2f   : > { %v446_v19 = vadd.f32 %v319_v10, %v318_v9  ;;  %v458_v20 = vadd.f32 %v327_v12, %v326_v11  ;;  %v328_v26 = vmul.f32 %v1066_v3, %v194_v17  ;;  %v329_v27 = vmul.f32 %v1068_v4, %v195_v18  ;;  %v201_v36 = vld [vmem:[%s1054_s4 + $0x88] sm:$0xff]  ;;  %v199_v38 = vld [vmem:[%s1054_s4 + $0x78] sm:$0xff]  ;;  %v202_v47 = vld [vmem:[%s1054_s4 + $0x90] sm:$0xff] }
  0x30   : > { %v452_v23 = vadd.f32 %v323_v15, %v322_v14  ;;  %v324_v28 = vmul.f32 %v1066_v3, %v190_v21  ;;  %v325_v29 = vmul.f32 %v1068_v4, %v191_v22  ;;  %v449_v30 = vadd.f32 %v321_v25, %v320_v24  ;;  %v203_v49 = vld [vmem:[%s1054_s4 + $0x98] sm:$0xff]  ;;  %v206_v50 = vld [vmem:[%s1054_s4 + $0xb0] sm:$0xff]  ;;  %v204_v52 = vld [vmem:[%s1054_s4 + $0xa0] sm:$0xff] }
  0x31   : > { %447 = vadd.xlane.f32.xlu0 %v446_v19  ;;  %459 = vadd.xlane.f32.xlu2 %v458_v20  ;;  %v461_v31 = vadd.f32 %v329_v27, %v328_v26  ;;  %v330_v39 = vmul.f32 %v1066_v3, %v196_v32  ;;  %v331_v40 = vmul.f32 %v1068_v4, %v197_v34  ;;  %v207_v51 = vld [vmem:[%s1054_s4 + $0xb8] sm:$0xff]  ;;  %v205_v53 = vld [vmem:[%s1054_s4 + $0xa8] sm:$0xff]  ;;  %v208_v62 = vld [vmem:[%s1054_s4 + $0xc0] sm:$0xff] }
  0x32   : > { %453 = vadd.xlane.f32.xlu1 %v452_v23  ;;  %v455_v33 = vadd.f32 %v325_v29, %v324_v28  ;;  %v334_v41 = vmul.f32 %v1066_v3, %v200_v35  ;;  %v335_v42 = vmul.f32 %v1068_v4, %v201_v36  ;;  %v332_v43 = vmul.f32 %v1066_v3, %v198_v37  ;;  %v209_v0 = vld [vmem:[%s1054_s4 + $0xc8] sm:$0xff]  ;;  %v212_v1 = vld [vmem:[%s1054_s4 + $0xe0] sm:$0xff]  ;;  %v210_v5 = vld [vmem:[%s1054_s4 + $0xd0] sm:$0xff] }
  0x33   : > { %v333_v44 = vmul.f32 %v1068_v4, %v199_v38  ;;  %v464_v45 = vadd.f32 %v331_v40, %v330_v39  ;;  %v336_v54 = vmul.f32 %v1066_v3, %v202_v47  ;;  %v337_v55 = vmul.f32 %v1068_v4, %v203_v49  ;;  %v213_v2 = vld [vmem:[%s1054_s4 + $0xe8] sm:$0xff]  ;;  %v211_v6 = vld [vmem:[%s1054_s4 + $0xd8] sm:$0xff]  ;;  %v214_v15 = vld [vmem:[%s1054_s4 + $0xf0] sm:$0xff] }
  0x34   : > { %v470_v46 = vadd.f32 %v335_v42, %v334_v41  ;;  %v340_v56 = vmul.f32 %v1066_v3, %v206_v50  ;;  %v341_v57 = vmul.f32 %v1068_v4, %v207_v51  ;;  %v338_v58 = vmul.f32 %v1066_v3, %v204_v52  ;;  %v215_v17 = vld [vmem:[%s1054_s4 + $0xf8] sm:$0xff]  ;;  %v218_v18 = vld [vmem:[%s1054_s4 + $0x110] sm:$0xff]  ;;  %v216_v20 = vld [vmem:[%s1054_s4 + $0x100] sm:$0xff] }
  0x35   : > { %v467_v48 = vadd.f32 %v333_v44, %v332_v43  ;;  %v339_v59 = vmul.f32 %v1068_v4, %v205_v53  ;;  %v473_v60 = vadd.f32 %v337_v55, %v336_v54  ;;  %v342_v7 = vmul.f32 %v1066_v3, %v208_v62  ;;  %v219_v19 = vld [vmem:[%s1054_s4 + $0x118] sm:$0xff]  ;;  %v217_v21 = vld [vmem:[%s1054_s4 + $0x108] sm:$0xff]  ;;  %v222_v35 = vld [vmem:[%s1054_s4 + $0x130] sm:$0xff] }
  0x36   : > { %v479_v61 = vadd.f32 %v341_v57, %v340_v56  ;;  %v343_v8 = vmul.f32 %v1068_v4, %v209_v0  ;;  %v346_v9 = vmul.f32 %v1066_v3, %v212_v1  ;;  %v347_v10 = vmul.f32 %v1068_v4, %v213_v2  ;;  %v221_v32 = vld [vmem:[%s1054_s4 + $0x128] sm:$0xff]  ;;  %v223_v36 = vld [vmem:[%s1054_s4 + $0x138] sm:$0xff]  ;;  %v228_v50 = vld [vmem:[%s1054_s4 + $0x160] sm:$0xff] }
  0x37   : > { %v476_v63 = vadd.f32 %v339_v59, %v338_v58  ;;  %v344_v11 = vmul.f32 %v1066_v3, %v210_v5  ;;  %v345_v12 = vmul.f32 %v1068_v4, %v211_v6  ;;  %v348_v22 = vmul.f32 %v1066_v3, %v214_v15  ;;  %v225_v34 = vld [vmem:[%s1054_s4 + $0x148] sm:$0xff]  ;;  %v227_v47 = vld [vmem:[%s1054_s4 + $0x158] sm:$0xff]  ;;  %v234_v1 = vld [vmem:[%s1054_s4 + $0x190] sm:$0xff] }
  0x38   : > { %v482_v13 = vadd.f32 %v343_v8, %v342_v7  ;;  %v488_v14 = vadd.f32 %v347_v10, %v346_v9  ;;  %v349_v23 = vmul.f32 %v1068_v4, %v215_v17  ;;  %v352_v24 = vmul.f32 %v1066_v3, %v218_v18  ;;  %v231_v49 = vld [vmem:[%s1054_s4 + $0x178] sm:$0xff]  ;;  %v229_v51 = vld [vmem:[%s1054_s4 + $0x168] sm:$0xff]  ;;  %v240_v18 = vld [vmem:[%s1054_s4 + $0x1c0] sm:$0xff] }
  0x39   : > { %450 = vadd.xlane.f32.xlu0 %v449_v30  ;;  %462 = vadd.xlane.f32.xlu2 %v461_v31  ;;  %v485_v16 = vadd.f32 %v345_v12, %v344_v11  ;;  %v353_v25 = vmul.f32 %v1068_v4, %v219_v19  ;;  %v350_v26 = vmul.f32 %v1066_v3, %v216_v20  ;;  %v220_v30 = vld [vmem:[%s1054_s4 + $0x120] sm:$0xff]  ;;  %v233_v62 = vld [vmem:[%s1054_s4 + $0x188] sm:$0xff]  ;;  %v235_v2 = vld [vmem:[%s1054_s4 + $0x198] sm:$0xff] }
  0x3a   : > { %456 = vadd.xlane.f32.xlu1 %v455_v33  ;;  %v351_v27 = vmul.f32 %v1068_v4, %v217_v21  ;;  %v491_v28 = vadd.f32 %v349_v23, %v348_v22  ;;  %v224_v33 = vld [vmem:[%s1054_s4 + $0x140] sm:$0xff]  ;;  %v354_v37 = vmul.f32 %v1066_v3, %v220_v30  ;;  %v355_v38 = vmul.f32 %v1068_v4, %v221_v32  ;;  %v237_v0 = vld [vmem:[%s1054_s4 + $0x1a8] sm:$0xff]  ;;  %v239_v15 = vld [vmem:[%s1054_s4 + $0x1b8] sm:$0xff] }
  0x3b   : > { %v497_v29 = vadd.f32 %v353_v25, %v352_v24  ;;  %v358_v39 = vmul.f32 %v1066_v3, %v224_v33  ;;  %v359_v40 = vmul.f32 %v1068_v4, %v225_v34  ;;  %v356_v41 = vmul.f32 %v1066_v3, %v222_v35  ;;  %v243_v17 = vld [vmem:[%s1054_s4 + $0x1d8] sm:$0xff]  ;;  %v241_v19 = vld [vmem:[%s1054_s4 + $0x1c8] sm:$0xff]  ;;  %v246_v33 = vld [vmem:[%s1054_s4 + $0x1f0] sm:$0xff] }
  0x3c   : > { %v494_v31 = vadd.f32 %v351_v27, %v350_v26  ;;  %v357_v42 = vmul.f32 %v1068_v4, %v223_v36  ;;  %v500_v43 = vadd.f32 %v355_v38, %v354_v37  ;;  %v361_v53 = vmul.f32 %v1068_v4, %v227_v47  ;;  %v245_v30 = vld [vmem:[%s1054_s4 + $0x1e8] sm:$0xff]  ;;  %v247_v34 = vld [vmem:[%s1054_s4 + $0x1f8] sm:$0xff] }
  0x3d   : > { %v506_v44 = vadd.f32 %v359_v40, %v358_v39  ;;  %v365_v55 = vmul.f32 %v1068_v4, %v231_v49  ;;  %v362_v56 = vmul.f32 %v1066_v3, %v228_v50  ;;  %v363_v57 = vmul.f32 %v1068_v4, %v229_v51  ;;  %v249_v32 = vld [vmem:[%s1054_s4 + $0x208] sm:$0xff]  ;;  %v255_v47 = vld [vmem:[%s1054_s4 + $0x238] sm:$0xff] }
  0x3e   : > { %v367_v6 = vmul.f32 %v1068_v4, %v233_v62  ;;  %v371_v8 = vmul.f32 %v1068_v4, %v237_v0  ;;  %v368_v9 = vmul.f32 %v1066_v3, %v234_v1  ;;  %v369_v10 = vmul.f32 %v1068_v4, %v235_v2  ;;  %v253_v49 = vld [vmem:[%s1054_s4 + $0x228] sm:$0xff]  ;;  %v259_v0 = vld [vmem:[%s1054_s4 + $0x258] sm:$0xff] }
  0x3f   : > { %v373_v21 = vmul.f32 %v1068_v4, %v239_v15  ;;  %v377_v23 = vmul.f32 %v1068_v4, %v243_v17  ;;  %v374_v24 = vmul.f32 %v1066_v3, %v240_v18  ;;  %v375_v25 = vmul.f32 %v1068_v4, %v241_v19  ;;  %v261_v62 = vld [vmem:[%s1054_s4 + $0x268] sm:$0xff]  ;;  %v267_v15 = vld [vmem:[%s1054_s4 + $0x298] sm:$0xff] }
  0x40   : > { %v379_v36 = vmul.f32 %v1068_v4, %v245_v30  ;;  %v383_v38 = vmul.f32 %v1068_v4, %v249_v32  ;;  %v380_v39 = vmul.f32 %v1066_v3, %v246_v33  ;;  %v381_v40 = vmul.f32 %v1068_v4, %v247_v34  ;;  %v265_v17 = vld [vmem:[%s1054_s4 + $0x288] sm:$0xff]  ;;  %v271_v32 = vld [vmem:[%s1054_s4 + $0x2b8] sm:$0xff] }
  0x41   : > { %465 = vadd.xlane.f32.xlu0 %v464_v45  ;;  %471 = vadd.xlane.f32.xlu2 %v470_v46  ;;  %v226_v45 = vld [vmem:[%s1054_s4 + $0x150] sm:$0xff]  ;;  %v503_v46 = vadd.f32 %v357_v42, %v356_v41  ;;  %v273_v30 = vld [vmem:[%s1054_s4 + $0x2c8] sm:$0xff] }
  0x42   : > { %468 = vadd.xlane.f32.xlu1 %v467_v48  ;;  %v230_v48 = vld [vmem:[%s1054_s4 + $0x170] sm:$0xff]  ;;  %v360_v52 = vmul.f32 %v1066_v3, %v226_v45  ;;  %v251_v45 = vld [vmem:[%s1054_s4 + $0x218] sm:$0xff] }
  0x43   : > { %v364_v54 = vmul.f32 %v1066_v3, %v230_v48  ;;  %v252_v48 = vld [vmem:[%s1054_s4 + $0x220] sm:$0xff]  ;;  %v385_v51 = vmul.f32 %v1068_v4, %v251_v45  ;;  %v279_v45 = vld [vmem:[%s1054_s4 + $0x2f8] sm:$0xff] }
  0x44   : > { %v509_v58 = vadd.f32 %v361_v53, %v360_v52  ;;  %v389_v53 = vmul.f32 %v1068_v4, %v255_v47  ;;  %v277_v47 = vld [vmem:[%s1054_s4 + $0x2e8] sm:$0xff] }
  0x45   : > { %v515_v59 = vadd.f32 %v365_v55, %v364_v54  ;;  %v386_v54 = vmul.f32 %v1066_v3, %v252_v48  ;;  %v387_v55 = vmul.f32 %v1068_v4, %v253_v49 }
  0x49   : > { %474 = vadd.xlane.f32.xlu0 %v473_v60  ;;  %480 = vadd.xlane.f32.xlu2 %v479_v61  ;;  %v232_v60 = vld [vmem:[%s1054_s4 + $0x180] sm:$0xff]  ;;  %v512_v61 = vadd.f32 %v363_v57, %v362_v56 }
  0x4a   : > { %477 = vadd.xlane.f32.xlu1 %v476_v63  ;;  %v236_v63 = vld [vmem:[%s1054_s4 + $0x1a0] sm:$0xff]  ;;  %v366_v5 = vmul.f32 %v1066_v3, %v232_v60  ;;  %v257_v60 = vld [vmem:[%s1054_s4 + $0x248] sm:$0xff] }
  0x4b   : > { %v370_v7 = vmul.f32 %v1066_v3, %v236_v63  ;;  %v258_v63 = vld [vmem:[%s1054_s4 + $0x250] sm:$0xff]  ;;  %v391_v2 = vmul.f32 %v1068_v4, %v257_v60 }
  0x4c   : > { %v518_v11 = vadd.f32 %v367_v6, %v366_v5  ;;  %v395_v6 = vmul.f32 %v1068_v4, %v261_v62  ;;  %v284_v62 = vld [vmem:[%s1054_s4 + $0x320] sm:$0xff] }
  0x4d   : > { %v524_v12 = vadd.f32 %v371_v8, %v370_v7  ;;  %v392_v7 = vmul.f32 %v1066_v3, %v258_v63  ;;  %v393_v8 = vmul.f32 %v1068_v4, %v259_v0  ;;  %v285_v63 = vld [vmem:[%s1054_s4 + $0x328] sm:$0xff]  ;;  %v282_v0 = vld [vmem:[%s1054_s4 + $0x310] sm:$0xff] }
  0x51   : > { %483 = vadd.xlane.f32.xlu0 %v482_v13  ;;  %489 = vadd.xlane.f32.xlu2 %v488_v14  ;;  %v238_v13 = vld [vmem:[%s1054_s4 + $0x1b0] sm:$0xff]  ;;  %v521_v14 = vadd.f32 %v369_v10, %v368_v9 }
  0x52   : > { %486 = vadd.xlane.f32.xlu1 %v485_v16  ;;  %v242_v16 = vld [vmem:[%s1054_s4 + $0x1d0] sm:$0xff]  ;;  %v372_v20 = vmul.f32 %v1066_v3, %v238_v13  ;;  %v263_v13 = vld [vmem:[%s1054_s4 + $0x278] sm:$0xff] }
  0x53   : > { %v376_v22 = vmul.f32 %v1066_v3, %v242_v16  ;;  %v264_v16 = vld [vmem:[%s1054_s4 + $0x280] sm:$0xff]  ;;  %v397_v19 = vmul.f32 %v1068_v4, %v263_v13 }
  0x54   : > { %v527_v26 = vadd.f32 %v373_v21, %v372_v20  ;;  %v401_v21 = vmul.f32 %v1068_v4, %v267_v15  ;;  %v286_v15 = vld [vmem:[%s1054_s4 + $0x330] sm:$0xff] }
  0x55   : > { %v533_v27 = vadd.f32 %v377_v23, %v376_v22  ;;  %v398_v22 = vmul.f32 %v1066_v3, %v264_v16  ;;  %v399_v23 = vmul.f32 %v1068_v4, %v265_v17  ;;  %v287_v17 = vld [vmem:[%s1054_s4 + $0x338] sm:$0xff] }
  0x59   : > { %492 = vadd.xlane.f32.xlu0 %v491_v28  ;;  %498 = vadd.xlane.f32.xlu2 %v497_v29  ;;  %v244_v28 = vld [vmem:[%s1054_s4 + $0x1e0] sm:$0xff]  ;;  %v530_v29 = vadd.f32 %v375_v25, %v374_v24 }
  0x5a   : > { %495 = vadd.xlane.f32.xlu1 %v494_v31  ;;  %v248_v31 = vld [vmem:[%s1054_s4 + $0x200] sm:$0xff]  ;;  %v378_v35 = vmul.f32 %v1066_v3, %v244_v28  ;;  %v269_v28 = vld [vmem:[%s1054_s4 + $0x2a8] sm:$0xff] }
  0x5b   : > { %v382_v37 = vmul.f32 %v1066_v3, %v248_v31  ;;  %v270_v31 = vld [vmem:[%s1054_s4 + $0x2b0] sm:$0xff]  ;;  %v403_v34 = vmul.f32 %v1068_v4, %v269_v28 }
  0x5c   : > { %v536_v41 = vadd.f32 %v379_v36, %v378_v35  ;;  %v407_v36 = vmul.f32 %v1068_v4, %v273_v30 }
  0x5d   : > { %v542_v42 = vadd.f32 %v383_v38, %v382_v37  ;;  %v404_v37 = vmul.f32 %v1066_v3, %v270_v31  ;;  %v405_v38 = vmul.f32 %v1068_v4, %v271_v32 }
  0x61   : > { %501 = vadd.xlane.f32.xlu0 %v500_v43  ;;  %507 = vadd.xlane.f32.xlu2 %v506_v44  ;;  %v250_v43 = vld [vmem:[%s1054_s4 + $0x210] sm:$0xff]  ;;  %v539_v44 = vadd.f32 %v381_v40, %v380_v39 }
  0x62   : > { %504 = vadd.xlane.f32.xlu1 %v503_v46  ;;  %v254_v46 = vld [vmem:[%s1054_s4 + $0x230] sm:$0xff]  ;;  %v384_v50 = vmul.f32 %v1066_v3, %v250_v43  ;;  %v275_v43 = vld [vmem:[%s1054_s4 + $0x2d8] sm:$0xff] }
  0x63   : > { %v388_v52 = vmul.f32 %v1066_v3, %v254_v46  ;;  %v276_v46 = vld [vmem:[%s1054_s4 + $0x2e0] sm:$0xff]  ;;  %v409_v49 = vmul.f32 %v1068_v4, %v275_v43 }
  0x64   : > { %v545_v56 = vadd.f32 %v385_v51, %v384_v50  ;;  %v413_v51 = vmul.f32 %v1068_v4, %v279_v45 }
  0x65   : > { %v551_v57 = vadd.f32 %v389_v53, %v388_v52  ;;  %v410_v52 = vmul.f32 %v1066_v3, %v276_v46  ;;  %v411_v53 = vmul.f32 %v1068_v4, %v277_v47 }
  0x67   : > { %v584_v60 = vadd.f32 %v411_v53, %v410_v52  ;;  %v299_v53 = vld [vmem:[%s1054_s4 + $0x398] sm:$0xff] }
  0x69   : > { %510 = vadd.xlane.f32.xlu0 %v509_v58  ;;  %516 = vadd.xlane.f32.xlu2 %v515_v59  ;;  %v256_v58 = vld [vmem:[%s1054_s4 + $0x240] sm:$0xff]  ;;  %v548_v59 = vadd.f32 %v387_v55, %v386_v54 }
  0x6a   : > { %513 = vadd.xlane.f32.xlu1 %v512_v61  ;;  %v260_v61 = vld [vmem:[%s1054_s4 + $0x260] sm:$0xff]  ;;  %v390_v1 = vmul.f32 %v1066_v3, %v256_v58 }
  0x6b   : > { %v394_v5 = vmul.f32 %v1066_v3, %v260_v61  ;;  %v281_v61 = vld [vmem:[%s1054_s4 + $0x308] sm:$0xff] }
  0x6c   : > { %v554_v9 = vadd.f32 %v391_v2, %v390_v1  ;;  %v283_v1 = vld [vmem:[%s1054_s4 + $0x318] sm:$0xff] }
  0x6d   : > { %v560_v10 = vadd.f32 %v395_v6, %v394_v5  ;;  %v415_v5 = vmul.f32 %v1068_v4, %v281_v61  ;;  %v418_v6 = vmul.f32 %v1066_v3, %v284_v62 }
  0x71   : > { %519 = vadd.xlane.f32.xlu0 %v518_v11  ;;  %525 = vadd.xlane.f32.xlu2 %v524_v12  ;;  %v262_v11 = vld [vmem:[%s1054_s4 + $0x270] sm:$0xff]  ;;  %v557_v12 = vadd.f32 %v393_v8, %v392_v7  ;;  %v419_v7 = vmul.f32 %v1068_v4, %v285_v63  ;;  %v416_v8 = vmul.f32 %v1066_v3, %v282_v0 }
  0x72   : > { %522 = vadd.xlane.f32.xlu1 %v521_v14  ;;  %v266_v14 = vld [vmem:[%s1054_s4 + $0x290] sm:$0xff]  ;;  %v396_v18 = vmul.f32 %v1066_v3, %v262_v11 }
  0x73   : > { %v400_v20 = vmul.f32 %v1066_v3, %v266_v14  ;;  %v596_v14 = vadd.f32 %v419_v7, %v418_v6  ;;  %v304_v7 = vld [vmem:[%s1054_s4 + $0x3c0] sm:$0xff] }
  0x74   : > { %v563_v24 = vadd.f32 %v397_v19, %v396_v18  ;;  %v290_v18 = vld [vmem:[%s1054_s4 + $0x350] sm:$0xff]  ;;  %v291_v19 = vld [vmem:[%s1054_s4 + $0x358] sm:$0xff] }
  0x75   : > { %v569_v25 = vadd.f32 %v401_v21, %v400_v20  ;;  %v288_v20 = vld [vmem:[%s1054_s4 + $0x340] sm:$0xff]  ;;  %v289_v21 = vld [vmem:[%s1054_s4 + $0x348] sm:$0xff] }
  0x79   : > { %528 = vadd.xlane.f32.xlu0 %v527_v26  ;;  %534 = vadd.xlane.f32.xlu2 %v533_v27  ;;  %v268_v26 = vld [vmem:[%s1054_s4 + $0x2a0] sm:$0xff]  ;;  %v566_v27 = vadd.f32 %v399_v23, %v398_v22  ;;  %v420_v22 = vmul.f32 %v1066_v3, %v286_v15  ;;  %v421_v23 = vmul.f32 %v1068_v4, %v287_v17 }
  0x7a   : > { %531 = vadd.xlane.f32.xlu1 %v530_v29  ;;  %v272_v29 = vld [vmem:[%s1054_s4 + $0x2c0] sm:$0xff]  ;;  %v402_v33 = vmul.f32 %v1066_v3, %v268_v26  ;;  %v422_v26 = vmul.f32 %v1066_v3, %v288_v20 }
  0x7b   : > { %v406_v35 = vmul.f32 %v1066_v3, %v272_v29  ;;  %v599_v30 = vadd.f32 %v421_v23, %v420_v22 }
  0x7c   : > { %v572_v39 = vadd.f32 %v403_v34, %v402_v33  ;;  %v292_v33 = vld [vmem:[%s1054_s4 + $0x360] sm:$0xff] }
  0x7d   : > { %v578_v40 = vadd.f32 %v407_v36, %v406_v35  ;;  %v293_v35 = vld [vmem:[%s1054_s4 + $0x368] sm:$0xff]  ;;  %v296_v36 = vld [vmem:[%s1054_s4 + $0x380] sm:$0xff] }
  0x81   : > { %537 = vadd.xlane.f32.xlu0 %v536_v41  ;;  %543 = vadd.xlane.f32.xlu2 %v542_v42  ;;  %v274_v41 = vld [vmem:[%s1054_s4 + $0x2d0] sm:$0xff]  ;;  %v575_v42 = vadd.f32 %v405_v38, %v404_v37  ;;  %v297_v37 = vld [vmem:[%s1054_s4 + $0x388] sm:$0xff] }
  0x82   : > { %540 = vadd.xlane.f32.xlu1 %v539_v44  ;;  %v278_v44 = vld [vmem:[%s1054_s4 + $0x2f0] sm:$0xff]  ;;  %v408_v48 = vmul.f32 %v1066_v3, %v274_v41  ;;  %v427_v41 = vmul.f32 %v1068_v4, %v293_v35  ;;  %v431_v43 = vmul.f32 %v1068_v4, %v297_v37 }
  0x83   : > { %v412_v50 = vmul.f32 %v1066_v3, %v278_v44  ;;  %v294_v38 = vld [vmem:[%s1054_s4 + $0x370] sm:$0xff] }
  0x84   : > { %v428_v44 = vmul.f32 %v1066_v3, %v294_v38 }
  0x85   : > { %v587_v58 = vadd.f32 %v413_v51, %v412_v50  ;;  %v298_v51 = vld [vmem:[%s1054_s4 + $0x390] sm:$0xff] }
  0x89   : > { %546 = vadd.xlane.f32.xlu0 %v545_v56  ;;  %552 = vadd.xlane.f32.xlu2 %v551_v57  ;;  %v581_v56 = vadd.f32 %v409_v49, %v408_v48 }
  0x8a   : > { %549 = vadd.xlane.f32.xlu1 %v548_v59  ;;  %v280_v59 = vld [vmem:[%s1054_s4 + $0x300] sm:$0xff] }
  0x8b   : > { %v414_v2 = vmul.f32 %v1066_v3, %v280_v59  ;;  %v433_v59 = vmul.f32 %v1068_v4, %v299_v53 }
  0x91   : > { %555 = vadd.xlane.f32.xlu0 %v554_v9  ;;  %561 = vadd.xlane.f32.xlu2 %v560_v10  ;;  %v417_v9 = vmul.f32 %v1068_v4, %v283_v1 }
  0x92   : > { %558 = vadd.xlane.f32.xlu1 %v557_v12  ;;  %v590_v12 = vadd.f32 %v415_v5, %v414_v2 }
  0x93   : > { %v593_v16 = vadd.f32 %v417_v9, %v416_v8  ;;  %v305_v9 = vld [vmem:[%s1054_s4 + $0x3c8] sm:$0xff] }
  0x94   : > { %v439_v15 = vmul.f32 %v1068_v4, %v305_v9 }
  0x99   : > { %564 = vadd.xlane.f32.xlu0 %v563_v24  ;;  %570 = vadd.xlane.f32.xlu2 %v569_v25  ;;  %v424_v24 = vmul.f32 %v1066_v3, %v290_v18  ;;  %v425_v25 = vmul.f32 %v1068_v4, %v291_v19 }
  0x9a   : > { %567 = vadd.xlane.f32.xlu1 %v566_v27  ;;  %v423_v27 = vmul.f32 %v1068_v4, %v289_v21 }
  0x9b   : > { %v605_v32 = vadd.f32 %v425_v25, %v424_v24 }
  0x9c   : > { %v602_v34 = vadd.f32 %v423_v27, %v422_v26  ;;  %v310_v26 = vld [vmem:[%s1054_s4 + $0x3f0] sm:$0xff]  ;;  %v311_v27 = vld [vmem:[%s1054_s4 + $0x3f8] sm:$0xff] }
  0xa1   : > { %573 = vadd.xlane.f32.xlu0 %v572_v39  ;;  %579 = vadd.xlane.f32.xlu2 %v578_v40  ;;  %v295_v39 = vld [vmem:[%s1054_s4 + $0x378] sm:$0xff]  ;;  %v426_v40 = vmul.f32 %v1066_v3, %v292_v33 }
  0xa2   : > { %576 = vadd.xlane.f32.xlu1 %v575_v42  ;;  %v430_v42 = vmul.f32 %v1066_v3, %v296_v36  ;;  %v429_v45 = vmul.f32 %v1068_v4, %v295_v39 }
  0xa3   : > { %v608_v48 = vadd.f32 %v427_v41, %v426_v40 }
  0xa4   : > { %v448_v54 = vpop.xlane.xlu0 %447  ;;  %v460_v55 = vpop.xlane.xlu2 %459  ;;  %v614_v50 = vadd.f32 %v431_v43, %v430_v42  ;;  %v611_v52 = vadd.f32 %v429_v45, %v428_v44 }
  0xa5   : > { %639 = vst.msk [vmem:[%s1263_s21] sm:$0xff] %vm638_vm0, %v448_v54  ;;  %v454_v57 = vpop.xlane.xlu1 %453  ;;  %v302_v54 = vld [vmem:[%s1054_s4 + $0x3b0] sm:$0xff] }
  0xa6   : > { %643 = vst.msk [vmem:[%s1263_s21 + $0x20] sm:$0xff] %vm638_vm0, %v460_v55  ;;  %v303_v55 = vld [vmem:[%s1054_s4 + $0x3b8] sm:$0xff] }
  0xa7   : > { %641 = vst.msk [vmem:[%s1263_s21 + $0x10] sm:$0xff] %vm638_vm0, %v454_v57  ;;  %v301_v57 = vld [vmem:[%s1054_s4 + $0x3a8] sm:$0xff]  ;;  %v437_v61 = vmul.f32 %v1068_v4, %v303_v55 }
  0xa8   : > { %v435_v63 = vmul.f32 %v1068_v4, %v301_v57 }
  0xa9   : > { %582 = vadd.xlane.f32.xlu0 %v581_v56  ;;  %588 = vadd.xlane.f32.xlu2 %v587_v58  ;;  %v300_v56 = vld [vmem:[%s1054_s4 + $0x3a0] sm:$0xff]  ;;  %v432_v58 = vmul.f32 %v1066_v3, %v298_v51 }
  0xaa   : > { %585 = vadd.xlane.f32.xlu1 %v584_v60  ;;  %v436_v60 = vmul.f32 %v1066_v3, %v302_v54  ;;  %v434_v62 = vmul.f32 %v1066_v3, %v300_v56 }
  0xab   : > { %v617_v2 = vadd.f32 %v433_v59, %v432_v58 }
  0xac   : > { %v451_v10 = vpop.xlane.xlu0 %450  ;;  %v463_v11 = vpop.xlane.xlu2 %462  ;;  %v623_v6 = vadd.f32 %v437_v61, %v436_v60  ;;  %v620_v8 = vadd.f32 %v435_v63, %v434_v62 }
  0xad   : > { %640 = vst.msk [vmem:[%s1263_s21 + $0x8] sm:$0xff] %vm638_vm0, %v451_v10  ;;  %v457_v13 = vpop.xlane.xlu1 %456  ;;  %v308_v10 = vld [vmem:[%s1054_s4 + $0x3e0] sm:$0xff] }
  0xae   : > { %644 = vst.msk [vmem:[%s1263_s21 + $0x28] sm:$0xff] %vm638_vm0, %v463_v11  ;;  %v309_v11 = vld [vmem:[%s1054_s4 + $0x3e8] sm:$0xff] }
  0xaf   : > { %642 = vst.msk [vmem:[%s1263_s21 + $0x18] sm:$0xff] %vm638_vm0, %v457_v13  ;;  %v307_v13 = vld [vmem:[%s1054_s4 + $0x3d8] sm:$0xff]  ;;  %v443_v17 = vmul.f32 %v1068_v4, %v309_v11 }
  0xb0   : > { %v441_v19 = vmul.f32 %v1068_v4, %v307_v13 }
  0xb1   : > { %591 = vadd.xlane.f32.xlu0 %v590_v12  ;;  %597 = vadd.xlane.f32.xlu2 %v596_v14  ;;  %v306_v12 = vld [vmem:[%s1054_s4 + $0x3d0] sm:$0xff]  ;;  %v438_v14 = vmul.f32 %v1066_v3, %v304_v7 }
  0xb2   : > { %594 = vadd.xlane.f32.xlu1 %v593_v16  ;;  %v442_v16 = vmul.f32 %v1066_v3, %v308_v10  ;;  %v440_v18 = vmul.f32 %v1066_v3, %v306_v12 }
  0xb3   : > { %v626_v22 = vadd.f32 %v439_v15, %v438_v14 }
  0xb4   : > { %v466_v28 = vpop.xlane.xlu0 %465  ;;  %v472_v29 = vpop.xlane.xlu2 %471  ;;  %v632_v24 = vadd.f32 %v443_v17, %v442_v16  ;;  %v629_v25 = vadd.f32 %v441_v19, %v440_v18 }
  0xb5   : > { %645 = vst.msk [vmem:[%s1263_s21 + $0x30] sm:$0xff] %vm638_vm0, %v466_v28  ;;  %v469_v31 = vpop.xlane.xlu1 %468  ;;  %v444_v28 = vmul.f32 %v1066_v3, %v310_v26 }
  0xb6   : > { %647 = vst.msk [vmem:[%s1263_s21 + $0x40] sm:$0xff] %vm638_vm0, %v472_v29  ;;  %v445_v29 = vmul.f32 %v1068_v4, %v311_v27 }
  0xb7   : > { %646 = vst.msk [vmem:[%s1263_s21 + $0x38] sm:$0xff] %vm638_vm0, %v469_v31 }
  0xb9   : > { %600 = vadd.xlane.f32.xlu0 %v599_v30  ;;  %606 = vadd.xlane.f32.xlu2 %v605_v32  ;;  %v635_v32 = vadd.f32 %v445_v29, %v444_v28 }
  0xba   : > { %603 = vadd.xlane.f32.xlu1 %v602_v34 }
  0xbc   : > { %v475_v46 = vpop.xlane.xlu0 %474  ;;  %v481_v47 = vpop.xlane.xlu2 %480 }
  0xbd   : > { %648 = vst.msk [vmem:[%s1263_s21 + $0x48] sm:$0xff] %vm638_vm0, %v475_v46  ;;  %v478_v49 = vpop.xlane.xlu1 %477 }
  0xbe   : > { %650 = vst.msk [vmem:[%s1263_s21 + $0x58] sm:$0xff] %vm638_vm0, %v481_v47 }
  0xbf   : > { %649 = vst.msk [vmem:[%s1263_s21 + $0x50] sm:$0xff] %vm638_vm0, %v478_v49 }
  0xc1   : > { %609 = vadd.xlane.f32.xlu0 %v608_v48  ;;  %615 = vadd.xlane.f32.xlu2 %v614_v50 }
  0xc2   : > { %612 = vadd.xlane.f32.xlu1 %v611_v52 }
  0xc4   : > { %v484_v0 = vpop.xlane.xlu0 %483  ;;  %v490_v1 = vpop.xlane.xlu2 %489 }
  0xc5   : > { %651 = vst.msk [vmem:[%s1263_s21 + $0x60] sm:$0xff] %vm638_vm0, %v484_v0  ;;  %v487_v5 = vpop.xlane.xlu1 %486 }
  0xc6   : > { %653 = vst.msk [vmem:[%s1263_s21 + $0x70] sm:$0xff] %vm638_vm0, %v490_v1 }
  0xc7   : > { %652 = vst.msk [vmem:[%s1263_s21 + $0x68] sm:$0xff] %vm638_vm0, %v487_v5 }
  0xc9   : > { %618 = vadd.xlane.f32.xlu0 %v617_v2  ;;  %624 = vadd.xlane.f32.xlu2 %v623_v6 }
  0xca   : > { %621 = vadd.xlane.f32.xlu1 %v620_v8 }
  0xcc   : > { %v493_v20 = vpop.xlane.xlu0 %492  ;;  %v499_v21 = vpop.xlane.xlu2 %498 }
  0xcd   : > { %654 = vst.msk [vmem:[%s1263_s21 + $0x78] sm:$0xff] %vm638_vm0, %v493_v20  ;;  %v496_v23 = vpop.xlane.xlu1 %495 }
  0xce   : > { %656 = vst.msk [vmem:[%s1263_s21 + $0x88] sm:$0xff] %vm638_vm0, %v499_v21 }
  0xcf   : > { %655 = vst.msk [vmem:[%s1263_s21 + $0x80] sm:$0xff] %vm638_vm0, %v496_v23 }
  0xd1   : > { %627 = vadd.xlane.f32.xlu0 %v626_v22  ;;  %633 = vadd.xlane.f32.xlu2 %v632_v24 }
  0xd2   : > { %630 = vadd.xlane.f32.xlu1 %v629_v25 }
  0xd4   : > { %v502_v30 = vpop.xlane.xlu0 %501  ;;  %v508_v31 = vpop.xlane.xlu2 %507 }
  0xd5   : > { %657 = vst.msk [vmem:[%s1263_s21 + $0x90] sm:$0xff] %vm638_vm0, %v502_v30  ;;  %v505_v33 = vpop.xlane.xlu1 %504 }
  0xd6   : > { %659 = vst.msk [vmem:[%s1263_s21 + $0xa0] sm:$0xff] %vm638_vm0, %v508_v31 }
  0xd7   : > { %658 = vst.msk [vmem:[%s1263_s21 + $0x98] sm:$0xff] %vm638_vm0, %v505_v33 }
  0xd9   : > { %636 = vadd.xlane.f32.xlu0 %v635_v32 }
  0xdc   : > { %v511_v3 = vpop.xlane.xlu0 %510  ;;  %v517_v34 = vpop.xlane.xlu2 %516 }
  0xdd   : > { %660 = vst.msk [vmem:[%s1263_s21 + $0xa8] sm:$0xff] %vm638_vm0, %v511_v3  ;;  %v514_v4 = vpop.xlane.xlu1 %513 }
  0xde   : > { %662 = vst.msk [vmem:[%s1263_s21 + $0xb8] sm:$0xff] %vm638_vm0, %v517_v34 }
  0xdf   : > { %661 = vst.msk [vmem:[%s1263_s21 + $0xb0] sm:$0xff] %vm638_vm0, %v514_v4 }
  0xe4   : > { %v520_v35 = vpop.xlane.xlu0 %519  ;;  %v526_v36 = vpop.xlane.xlu2 %525 }
  0xe5   : > { %663 = vst.msk [vmem:[%s1263_s21 + $0xc0] sm:$0xff] %vm638_vm0, %v520_v35  ;;  %v523_v37 = vpop.xlane.xlu1 %522 }
  0xe6   : > { %665 = vst.msk [vmem:[%s1263_s21 + $0xd0] sm:$0xff] %vm638_vm0, %v526_v36 }
  0xe7   : > { %664 = vst.msk [vmem:[%s1263_s21 + $0xc8] sm:$0xff] %vm638_vm0, %v523_v37 }
  0xec   : > { %v529_v38 = vpop.xlane.xlu0 %528  ;;  %v535_v39 = vpop.xlane.xlu2 %534 }
  0xed   : > { %666 = vst.msk [vmem:[%s1263_s21 + $0xd8] sm:$0xff] %vm638_vm0, %v529_v38  ;;  %v532_v40 = vpop.xlane.xlu1 %531 }
  0xee   : > { %668 = vst.msk [vmem:[%s1263_s21 + $0xe8] sm:$0xff] %vm638_vm0, %v535_v39 }
  0xef   : > { %667 = vst.msk [vmem:[%s1263_s21 + $0xe0] sm:$0xff] %vm638_vm0, %v532_v40 }
  0xf4   : > { %v538_v41 = vpop.xlane.xlu0 %537  ;;  %v544_v42 = vpop.xlane.xlu2 %543 }
  0xf5   : > { %669 = vst.msk [vmem:[%s1263_s21 + $0xf0] sm:$0xff] %vm638_vm0, %v538_v41  ;;  %v541_v43 = vpop.xlane.xlu1 %540 }
  0xf6   : > { %671 = vst.msk [vmem:[%s1263_s21 + $0x100] sm:$0xff] %vm638_vm0, %v544_v42 }
  0xf7   : > { %670 = vst.msk [vmem:[%s1263_s21 + $0xf8] sm:$0xff] %vm638_vm0, %v541_v43 }
  0xfc   : > { %v547_v44 = vpop.xlane.xlu0 %546  ;;  %v553_v45 = vpop.xlane.xlu2 %552 }
  0xfd   : > { %672 = vst.msk [vmem:[%s1263_s21 + $0x108] sm:$0xff] %vm638_vm0, %v547_v44  ;;  %v550_v46 = vpop.xlane.xlu1 %549 }
  0xfe   : > { %674 = vst.msk [vmem:[%s1263_s21 + $0x118] sm:$0xff] %vm638_vm0, %v553_v45 }
  0xff   : > { %673 = vst.msk [vmem:[%s1263_s21 + $0x110] sm:$0xff] %vm638_vm0, %v550_v46 }
 0x104   : > { %v556_v47 = vpop.xlane.xlu0 %555  ;;  %v562_v48 = vpop.xlane.xlu2 %561 }
 0x105   : > { %675 = vst.msk [vmem:[%s1263_s21 + $0x120] sm:$0xff] %vm638_vm0, %v556_v47  ;;  %v559_v49 = vpop.xlane.xlu1 %558 }
 0x106   : > { %677 = vst.msk [vmem:[%s1263_s21 + $0x130] sm:$0xff] %vm638_vm0, %v562_v48 }
 0x107   : > { %676 = vst.msk [vmem:[%s1263_s21 + $0x128] sm:$0xff] %vm638_vm0, %v559_v49 }
 0x10c   : > { %v565_v50 = vpop.xlane.xlu0 %564  ;;  %v571_v51 = vpop.xlane.xlu2 %570 }
 0x10d   : > { %678 = vst.msk [vmem:[%s1263_s21 + $0x138] sm:$0xff] %vm638_vm0, %v565_v50  ;;  %v568_v52 = vpop.xlane.xlu1 %567 }
 0x10e   : > { %680 = vst.msk [vmem:[%s1263_s21 + $0x148] sm:$0xff] %vm638_vm0, %v571_v51 }
 0x10f   : > { %679 = vst.msk [vmem:[%s1263_s21 + $0x140] sm:$0xff] %vm638_vm0, %v568_v52 }
 0x114   : > { %v574_v53 = vpop.xlane.xlu0 %573  ;;  %v580_v54 = vpop.xlane.xlu2 %579 }
 0x115   : > { %681 = vst.msk [vmem:[%s1263_s21 + $0x150] sm:$0xff] %vm638_vm0, %v574_v53  ;;  %v577_v55 = vpop.xlane.xlu1 %576 }
 0x116   : > { %683 = vst.msk [vmem:[%s1263_s21 + $0x160] sm:$0xff] %vm638_vm0, %v580_v54 }
 0x117   : > { %682 = vst.msk [vmem:[%s1263_s21 + $0x158] sm:$0xff] %vm638_vm0, %v577_v55 }
 0x11c   : > { %v583_v56 = vpop.xlane.xlu0 %582  ;;  %v589_v57 = vpop.xlane.xlu2 %588 }
 0x11d   : > { %684 = vst.msk [vmem:[%s1263_s21 + $0x168] sm:$0xff] %vm638_vm0, %v583_v56  ;;  %v586_v58 = vpop.xlane.xlu1 %585 }
 0x11e   : > { %686 = vst.msk [vmem:[%s1263_s21 + $0x178] sm:$0xff] %vm638_vm0, %v589_v57 }
 0x11f   : > { %685 = vst.msk [vmem:[%s1263_s21 + $0x170] sm:$0xff] %vm638_vm0, %v586_v58 }
 0x124   : > { %v592_v59 = vpop.xlane.xlu0 %591  ;;  %v598_v60 = vpop.xlane.xlu2 %597 }
 0x125   : > { %687 = vst.msk [vmem:[%s1263_s21 + $0x180] sm:$0xff] %vm638_vm0, %v592_v59  ;;  %v595_v61 = vpop.xlane.xlu1 %594 }
 0x126   : > { %689 = vst.msk [vmem:[%s1263_s21 + $0x190] sm:$0xff] %vm638_vm0, %v598_v60 }
 0x127   : > { %688 = vst.msk [vmem:[%s1263_s21 + $0x188] sm:$0xff] %vm638_vm0, %v595_v61 }
 0x12c   : > { %v601_v62 = vpop.xlane.xlu0 %600  ;;  %v607_v63 = vpop.xlane.xlu2 %606 }
 0x12d   : > { %690 = vst.msk [vmem:[%s1263_s21 + $0x198] sm:$0xff] %vm638_vm0, %v601_v62  ;;  %v604_v0 = vpop.xlane.xlu1 %603 }
 0x12e   : > { %692 = vst.msk [vmem:[%s1263_s21 + $0x1a8] sm:$0xff] %vm638_vm0, %v607_v63 }
 0x12f   : > { %691 = vst.msk [vmem:[%s1263_s21 + $0x1a0] sm:$0xff] %vm638_vm0, %v604_v0 }
 0x134   : > { %v610_v1 = vpop.xlane.xlu0 %609  ;;  %v616_v2 = vpop.xlane.xlu2 %615 }
 0x135   : > { %693 = vst.msk [vmem:[%s1263_s21 + $0x1b0] sm:$0xff] %vm638_vm0, %v610_v1  ;;  %v613_v5 = vpop.xlane.xlu1 %612 }
 0x136   : > { %695 = vst.msk [vmem:[%s1263_s21 + $0x1c0] sm:$0xff] %vm638_vm0, %v616_v2 }
 0x137   : > { %694 = vst.msk [vmem:[%s1263_s21 + $0x1b8] sm:$0xff] %vm638_vm0, %v613_v5 }
 0x13c   : > { %v619_v6 = vpop.xlane.xlu0 %618  ;;  %v625_v7 = vpop.xlane.xlu2 %624 }
 0x13d   : > { %696 = vst.msk [vmem:[%s1263_s21 + $0x1c8] sm:$0xff] %vm638_vm0, %v619_v6  ;;  %v622_v8 = vpop.xlane.xlu1 %621 }
 0x13e   : > { %698 = vst.msk [vmem:[%s1263_s21 + $0x1d8] sm:$0xff] %vm638_vm0, %v625_v7 }
 0x13f   : > { %697 = vst.msk [vmem:[%s1263_s21 + $0x1d0] sm:$0xff] %vm638_vm0, %v622_v8 }
 0x144   : > { %v628_v9 = vpop.xlane.xlu0 %627  ;;  %v634_v10 = vpop.xlane.xlu2 %633 }
 0x145   : > { %699 = vst.msk [vmem:[%s1263_s21 + $0x1e0] sm:$0xff] %vm638_vm0, %v628_v9  ;;  %v631_v11 = vpop.xlane.xlu1 %630 }
 0x146   : > { %701 = vst.msk [vmem:[%s1263_s21 + $0x1f0] sm:$0xff] %vm638_vm0, %v634_v10 }
 0x147   : > { %700 = vst.msk [vmem:[%s1263_s21 + $0x1e8] sm:$0xff] %vm638_vm0, %v631_v11 }
 0x14c   : > { %v637_v12 = vpop.xlane.xlu0 %636 }
 0x14d   : > { %702 = vst.msk [vmem:[%s1263_s21 + $0x1f8] sm:$0xff] %vm638_vm0, %v637_v12 }
 0x14e PF: > { %p13_p8 = scmp.ge.s32.totalorder %s988_s14, 4   ;;  %s1480_s9 = smov %s940_s10 }
 0x14f   : > { %s1481_s10 = smov %s944_s11  ;;  %s1482_s11 = smov %s998_s17 }
 0x150   : > { %s1483_s12 = smov %s988_s14  ;;  %15 = sbr.rel (!%p13_p8) target bundleno = 4 (0x4), region = 72 }
 0x155   :  { %725 = vsyncpa [#allocation3], 1 }
 0x156   :  { %727 = vsyncpa [#allocation3 + $0x1], 1 }
 0x157   :  { %728 = vsyncpa [#allocation5], 1 }

</bundles_post_ra>
